<compile_context>
chip_gen: v6e
topology: v6e:2x2x1
jax: 0.10.0
libtpu: 0.0.40
codegen_flags: <defaults>
</compile_context>

<pallas_src>
import jax
import jax.numpy as jnp
from jax.experimental import pallas as pl
from jax.experimental.pallas import tpu as pltpu


_SMALL_C_MAX = 8  # up to this C the channel mix runs on the VPU (no MXU)


def _round_up(x, m):
    return ((x + m - 1) // m) * m


# ---------------------------------------------------------------------------
# Kernels
# ---------------------------------------------------------------------------

def _small_c_kernel(x_ref, w_ref, b_ref, o_ref):
    """Small-C path: folded Normalize + 1x1 conv + ReLU as VPU scalar*vector FMAs.

    x_ref: (C, T) VMEM tile in the input's native dtype (batch dim squeezed).
    w_ref: (C*C,) f32 in SMEM, row-major folded weight  W' = W / std.
    b_ref: (C,)   f32 in SMEM, folded bias              b' = b - W' @ mean.
    """
    C = o_ref.shape[0]
    # Load each input-channel row once, promote to f32 on the VPU.
    xs = [x_ref[c:c + 1, :].astype(jnp.float32) for c in range(C)]
    rows = []
    for o in range(C):                       # fully unrolled: C is tiny & static
        acc = xs[0] * w_ref[o * C + 0]
        for c in range(1, C):
            acc = acc + xs[c] * w_ref[o * C + c]
        rows.append(acc + b_ref[o])
    y = jnp.concatenate(rows, axis=0)                       # (C, T) f32
    o_ref[...] = jnp.maximum(y, 0.0).astype(o_ref.dtype)    # ReLU + cast, one dense store


def _mxu_kernel(x_ref, w_ref, b_ref, o_ref):
    """Large-C path: folded channel mix on the MXU; W'/b' stay f32 for accuracy."""
    x = x_ref[...].astype(jnp.float32)                               # (C, T)
    y = jnp.dot(w_ref[...], x, preferred_element_type=jnp.float32)   # (C, T) f32
    y = y + b_ref[...]                                               # bias (C, 1)
    o_ref[...] = jnp.maximum(y, 0.0).astype(o_ref.dtype)


# ---------------------------------------------------------------------------
# Tiling / budgeting helpers
# ---------------------------------------------------------------------------

def _tpu_budgets():
    """Generation-aware (tile_budget_bytes, vmem_limit_cap). Conservative fallback."""
    vmem_phys = None
    try:
        info = pltpu.get_tpu_info()
        vmem_phys = getattr(info, "vmem_capacity_bytes", None)
    except Exception:
        vmem_phys = None
    if vmem_phys is None or vmem_phys <= 64 * 1024 * 1024:
        # v7x-class (64 MiB physical per TC) or unknown: leave headroom.
        return 2 * 1024 * 1024, 48 * 1024 * 1024
    # 128-MiB-VMEM parts (v5e / v6e): bigger tiles amortize per-step overhead.
    return 6 * 1024 * 1024, 80 * 1024 * 1024


def _choose_hw_tile(hw_pad, c_pad, x_itemsize, out_itemsize, max_tile_bytes, want_steps):
    """Largest multiple-of-128 divisor of hw_pad whose padded (c_pad, T) x+out
    tiles fit the budget.  hw_pad is a multiple of 128, so 128 always divides.
    want_steps > 1 additionally caps T so the hw grid has >= want_steps steps."""
    bytes_per_lane = c_pad * (x_itemsize + out_itemsize)
    max_lanes = max(128, (max_tile_bytes // max(bytes_per_lane, 1)) // 128 * 128)
    upper = min(max_lanes, hw_pad)
    if want_steps > 1:
        upper = min(upper, max(128, (hw_pad // want_steps) // 128 * 128))
    t = (upper // 128) * 128
    while t >= 128:
        if hw_pad % t == 0:
            return t
        t -= 128
    return 128


# ---------------------------------------------------------------------------
# Wrapper
# ---------------------------------------------------------------------------

def transform_applier(x_nchw, mean, std, w, b, out_dtype=None):
    """Apply the fused transform list (Normalize -> 1x1 conv -> ReLU) to NCHW input.

    Normalize is folded into the conv params in the wrapper (W' = W/std,
    b' = b - W'@mean, both kept in f32).  x is read in its native dtype (no
    wrapper-side cast / extra HBM pass); `out_dtype` only changes the output store.
    """
    B, C, H, W_sp = x_nchw.shape
    HW = H * W_sp
    x_dtype = x_nchw.dtype
    if out_dtype is None:
        out_dtype = x_dtype
    x_itemsize = jnp.dtype(x_dtype).itemsize
    out_itemsize = jnp.dtype(out_dtype).itemsize

    # ---- Fold Normalize into the 1x1-conv parameters (tiny, stays f32). ----
    mean_f = mean.astype(jnp.float32)
    std_f = std.astype(jnp.float32)
    w_folded = w.astype(jnp.float32) * (1.0 / std_f)[None, :]   # (C, C) f32
    b_folded = b.astype(jnp.float32) - w_folded @ mean_f        # (C,)   f32

    # ---- Flatten spatial dims; pad HW to a multiple of 128 (lane-dense stores). ----
    x_flat = x_nchw.reshape(B, C, HW)
    HW_pad = _round_up(HW, 128)
    if HW_pad != HW:
        x_flat = jnp.pad(x_flat, ((0, 0), (0, 0), (0, HW_pad - HW)))

    # ---- Generation-aware tiling (sublane-padded channel count). ----
    max_tile_bytes, vmem_cap = _tpu_budgets()
    packing_x = max(1, 4 // x_itemsize)
    c_pad = _round_up(C, 8 * packing_x)
    want_steps = 2 if B == 1 else 1            # keep >=2 grid steps for 2-TC parts
    T = _choose_hw_tile(HW_pad, c_pad, x_itemsize, out_itemsize,
                        max_tile_bytes, want_steps)
    n_hw = HW_pad // T

    small_c = C <= _SMALL_C_MAX

    # VMEM working-set estimate: double-buffered x/out tiles (+ resident f32
    # weight/bias on the MXU path; small-C params live in SMEM, ~0 VMEM).
    work = 2 * c_pad * T * (x_itemsize + out_itemsize) + (4 << 20)
    if not small_c:
        work += 2 * (C * C + C) * 4   # constant-index weight still double-buffered
        # Note: for very large C, stage the (C, C) weight once into a VMEM scratch
        # (single buffer) and add an 'arbitrary' K-tile axis with an f32 accumulator.
    vmem_limit = int(min(vmem_cap, max(32 * 1024 * 1024, work)))

    cost = pl.CostEstimate(
        flops=2 * B * C * C * HW_pad + 2 * B * C * HW_pad,
        transcendentals=0,
        bytes_accessed=B * C * HW_pad * (x_itemsize + out_itemsize) + (C * C + C) * 4,
    )

    x_spec = pl.BlockSpec((pl.Squeezed(), C, T), lambda bi, hi: (bi, 0, hi))
    o_spec = pl.BlockSpec((pl.Squeezed(), C, T), lambda bi, hi: (bi, 0, hi))

    if small_c:
        kernel = _small_c_kernel
        w_arg = w_folded.reshape(C * C)            # f32 scalars in SMEM
        b_arg = b_folded                           # (C,) f32 in SMEM
        w_spec = pl.BlockSpec(memory_space=pltpu.MemorySpace.SMEM)
        b_spec = pl.BlockSpec(memory_space=pltpu.MemorySpace.SMEM)
    else:
        kernel = _mxu_kernel
        w_arg = w_folded                           # (C, C) f32, VMEM-resident
        b_arg = b_folded.reshape(C, 1)             # (C, 1) f32
        w_spec = pl.BlockSpec((C, C), lambda bi, hi: (0, 0))
        b_spec = pl.BlockSpec((C, 1), lambda bi, hi: (0, 0))

    out_flat = pl.pallas_call(
        kernel,
        out_shape=jax.ShapeDtypeStruct((B, C, HW_pad), out_dtype),
        grid_spec=pltpu.PrefetchScalarGridSpec(
            num_scalar_prefetch=0,
            grid=(B, n_hw),
            in_specs=[x_spec, w_spec, b_spec],
            out_specs=o_spec,
        ),
        compiler_params=pltpu.CompilerParams(
            dimension_semantics=("parallel", "parallel"),
            vmem_limit_bytes=vmem_limit,
        ),
        cost_estimate=cost,
    )(x_flat, w_arg, b_arg)

    if HW_pad != HW:
        out_flat = out_flat[:, :, :HW]
    return out_flat.reshape(B, C, H, W_sp)


def _reference(x_nchw, mean, std, w, b):
    """Pure-JAX reference matching the PyTorch nn.Sequential semantics."""
    B, C, H, W = x_nchw.shape
    xn = (x_nchw - mean.reshape(1, C, 1, 1)) / std.reshape(1, C, 1, 1)
    y = jnp.einsum("oc,bchw->bohw", w, xn) + b.reshape(1, C, 1, 1)
    return jnp.maximum(y, 0.0)


if __name__ == "__main__":
    key = jax.random.PRNGKey(0)
    k_x, k_w, k_b, k_xo, k_xb, k_w2, k_b2 = jax.random.split(key, 7)

    # --- Small-C (VPU/SMEM path): B=2, C=4, 16x16 spatial. ---
    B, C, H, W = 2, 4, 16, 16
    x = jax.random.normal(k_x, (B, C, H, W), dtype=jnp.float32)
    mean = jnp.arange(C, dtype=jnp.float32) * 0.1
    std = jnp.full((C,), 0.5, dtype=jnp.float32)
    w = jax.random.normal(k_w, (C, C), dtype=jnp.float32) * 0.3
    b = jax.random.normal(k_b, (C,), dtype=jnp.float32) * 0.1

    ref = _reference(x, mean, std, w, b)
    out = jax.block_until_ready(transform_applier(x, mean, std, w, b))
    assert out.shape == (B, C, H, W) and out.dtype == jnp.float32
    assert jnp.allclose(out, ref, atol=1e-4, rtol=1e-4)

    # bf16 output only (x read in native f32; no wrapper-side cast of x).
    out_bf16 = jax.block_until_ready(
        transform_applier(x, mean, std, w, b, out_dtype=jnp.bfloat16))
    assert out_bf16.dtype == jnp.bfloat16
    assert jnp.allclose(out_bf16.astype(jnp.float32), ref, atol=2e-2, rtol=2e-2)

    # Non-multiple-of-128 spatial extent -> padded-HW path.
    H2 = W2 = 9
    x_odd = jax.random.normal(k_xo, (1, C, H2, W2), dtype=jnp.float32)
    ref_odd = _reference(x_odd, mean, std, w, b)
    out_odd = jax.block_until_ready(transform_applier(x_odd, mean, std, w, b))
    assert out_odd.shape == (1, C, H2, W2)
    assert jnp.allclose(out_odd, ref_odd, atol=1e-4, rtol=1e-4)

    # --- Large-C (MXU path), B=1 so the hw grid splits into >=2 steps. ---
    C2 = 64
    x_big = jax.random.normal(k_xb, (1, C2, 16, 16), dtype=jnp.float32)
    mean2 = jnp.linspace(-0.2, 0.2, C2, dtype=jnp.float32)
    std2 = jnp.linspace(0.5, 1.5, C2, dtype=jnp.float32)
    w2 = jax.random.normal(k_w2, (C2, C2), dtype=jnp.float32) * 0.1
    b2 = jax.random.normal(k_b2, (C2,), dtype=jnp.float32) * 0.1
    ref2 = _reference(x_big, mean2, std2, w2, b2)
    out2 = jax.block_until_ready(transform_applier(x_big, mean2, std2, w2, b2))
    assert jnp.allclose(out2, ref2, atol=5e-3, rtol=5e-3)

    print("KERNEL_OK")
</pallas_src>

<mosaic_0001>
module attributes {stable_mosaic.version = 11 : i64} {
  func.func @_small_c_kernel(%arg0: i32, %arg1: i32, %arg2: memref<1x4x256xf32, #tpu.memory_space<vmem>>, %arg3: memref<16xf32, #tpu.memory_space<smem>>, %arg4: memref<4xf32, #tpu.memory_space<smem>>, %arg5: memref<1x4x256xf32, #tpu.memory_space<vmem>>) attributes {dimension_semantics = [#tpu.dimension_semantics<parallel>, #tpu.dimension_semantics<parallel>], iteration_bounds = array<i64: 2, 1>, scalar_prefetch = 0 : i64, scratch_operands = 0 : i64, tpu.core_type = #tpu.core_type<tc>, window_params = [{transform_indices = @transform_0, window_bounds = array<i64: 1, 4, 256>}, {transform_indices = @transform_1, window_bounds = array<i64: 16>}, {transform_indices = @transform_2, window_bounds = array<i64: 4>}, {transform_indices = @transform_3, window_bounds = array<i64: 1, 4, 256>}]} {
    %c0 = arith.constant 0 : index
    %c0_0 = arith.constant 0 : index
    %c0_1 = arith.constant 0 : index
    %0 = vector.load %arg2[%c0, %c0_0, %c0_1] : memref<1x4x256xf32, #tpu.memory_space<vmem>>, vector<1x1x256xf32>
    %1 = vector.shape_cast %0 : vector<1x1x256xf32> to vector<1x256xf32>
    %c0_2 = arith.constant 0 : index
    %c1 = arith.constant 1 : index
    %c0_3 = arith.constant 0 : index
    %2 = vector.load %arg2[%c0_2, %c1, %c0_3] : memref<1x4x256xf32, #tpu.memory_space<vmem>>, vector<1x1x256xf32>
    %3 = vector.shape_cast %2 : vector<1x1x256xf32> to vector<1x256xf32>
    %c0_4 = arith.constant 0 : index
    %c2 = arith.constant 2 : index
    %c0_5 = arith.constant 0 : index
    %4 = vector.load %arg2[%c0_4, %c2, %c0_5] : memref<1x4x256xf32, #tpu.memory_space<vmem>>, vector<1x1x256xf32>
    %5 = vector.shape_cast %4 : vector<1x1x256xf32> to vector<1x256xf32>
    %c0_6 = arith.constant 0 : index
    %c3 = arith.constant 3 : index
    %c0_7 = arith.constant 0 : index
    %6 = vector.load %arg2[%c0_6, %c3, %c0_7] : memref<1x4x256xf32, #tpu.memory_space<vmem>>, vector<1x1x256xf32>
    %7 = vector.shape_cast %6 : vector<1x1x256xf32> to vector<1x256xf32>
    %c0_8 = arith.constant 0 : index
    %8 = memref.load %arg3[%c0_8] : memref<16xf32, #tpu.memory_space<smem>>
    %9 = vector.broadcast %8 : f32 to vector<1x256xf32>
    %10 = arith.mulf %1, %9 : vector<1x256xf32>
    %c1_9 = arith.constant 1 : index
    %11 = memref.load %arg3[%c1_9] : memref<16xf32, #tpu.memory_space<smem>>
    %12 = vector.broadcast %11 : f32 to vector<1x256xf32>
    %13 = arith.mulf %3, %12 : vector<1x256xf32>
    %14 = arith.addf %10, %13 : vector<1x256xf32>
    %c2_10 = arith.constant 2 : index
    %15 = memref.load %arg3[%c2_10] : memref<16xf32, #tpu.memory_space<smem>>
    %16 = vector.broadcast %15 : f32 to vector<1x256xf32>
    %17 = arith.mulf %5, %16 : vector<1x256xf32>
    %18 = arith.addf %14, %17 : vector<1x256xf32>
    %c3_11 = arith.constant 3 : index
    %19 = memref.load %arg3[%c3_11] : memref<16xf32, #tpu.memory_space<smem>>
    %20 = vector.broadcast %19 : f32 to vector<1x256xf32>
    %21 = arith.mulf %7, %20 : vector<1x256xf32>
    %22 = arith.addf %18, %21 : vector<1x256xf32>
    %c0_12 = arith.constant 0 : index
    %23 = memref.load %arg4[%c0_12] : memref<4xf32, #tpu.memory_space<smem>>
    %24 = vector.broadcast %23 : f32 to vector<1x256xf32>
    %25 = arith.addf %22, %24 : vector<1x256xf32>
    %c4 = arith.constant 4 : index
    %26 = memref.load %arg3[%c4] : memref<16xf32, #tpu.memory_space<smem>>
    %27 = vector.broadcast %26 : f32 to vector<1x256xf32>
    %28 = arith.mulf %1, %27 : vector<1x256xf32>
    %c5 = arith.constant 5 : index
    %29 = memref.load %arg3[%c5] : memref<16xf32, #tpu.memory_space<smem>>
    %30 = vector.broadcast %29 : f32 to vector<1x256xf32>
    %31 = arith.mulf %3, %30 : vector<1x256xf32>
    %32 = arith.addf %28, %31 : vector<1x256xf32>
    %c6 = arith.constant 6 : index
    %33 = memref.load %arg3[%c6] : memref<16xf32, #tpu.memory_space<smem>>
    %34 = vector.broadcast %33 : f32 to vector<1x256xf32>
    %35 = arith.mulf %5, %34 : vector<1x256xf32>
    %36 = arith.addf %32, %35 : vector<1x256xf32>
    %c7 = arith.constant 7 : index
    %37 = memref.load %arg3[%c7] : memref<16xf32, #tpu.memory_space<smem>>
    %38 = vector.broadcast %37 : f32 to vector<1x256xf32>
    %39 = arith.mulf %7, %38 : vector<1x256xf32>
    %40 = arith.addf %36, %39 : vector<1x256xf32>
    %c1_13 = arith.constant 1 : index
    %41 = memref.load %arg4[%c1_13] : memref<4xf32, #tpu.memory_space<smem>>
    %42 = vector.broadcast %41 : f32 to vector<1x256xf32>
    %43 = arith.addf %40, %42 : vector<1x256xf32>
    %c8 = arith.constant 8 : index
    %44 = memref.load %arg3[%c8] : memref<16xf32, #tpu.memory_space<smem>>
    %45 = vector.broadcast %44 : f32 to vector<1x256xf32>
    %46 = arith.mulf %1, %45 : vector<1x256xf32>
    %c9 = arith.constant 9 : index
    %47 = memref.load %arg3[%c9] : memref<16xf32, #tpu.memory_space<smem>>
    %48 = vector.broadcast %47 : f32 to vector<1x256xf32>
    %49 = arith.mulf %3, %48 : vector<1x256xf32>
    %50 = arith.addf %46, %49 : vector<1x256xf32>
    %c10 = arith.constant 10 : index
    %51 = memref.load %arg3[%c10] : memref<16xf32, #tpu.memory_space<smem>>
    %52 = vector.broadcast %51 : f32 to vector<1x256xf32>
    %53 = arith.mulf %5, %52 : vector<1x256xf32>
    %54 = arith.addf %50, %53 : vector<1x256xf32>
    %c11 = arith.constant 11 : index
    %55 = memref.load %arg3[%c11] : memref<16xf32, #tpu.memory_space<smem>>
    %56 = vector.broadcast %55 : f32 to vector<1x256xf32>
    %57 = arith.mulf %7, %56 : vector<1x256xf32>
    %58 = arith.addf %54, %57 : vector<1x256xf32>
    %c2_14 = arith.constant 2 : index
    %59 = memref.load %arg4[%c2_14] : memref<4xf32, #tpu.memory_space<smem>>
    %60 = vector.broadcast %59 : f32 to vector<1x256xf32>
    %61 = arith.addf %58, %60 : vector<1x256xf32>
    %c12 = arith.constant 12 : index
    %62 = memref.load %arg3[%c12] : memref<16xf32, #tpu.memory_space<smem>>
    %63 = vector.broadcast %62 : f32 to vector<1x256xf32>
    %64 = arith.mulf %1, %63 : vector<1x256xf32>
    %c13 = arith.constant 13 : index
    %65 = memref.load %arg3[%c13] : memref<16xf32, #tpu.memory_space<smem>>
    %66 = vector.broadcast %65 : f32 to vector<1x256xf32>
    %67 = arith.mulf %3, %66 : vector<1x256xf32>
    %68 = arith.addf %64, %67 : vector<1x256xf32>
    %c14 = arith.constant 14 : index
    %69 = memref.load %arg3[%c14] : memref<16xf32, #tpu.memory_space<smem>>
    %70 = vector.broadcast %69 : f32 to vector<1x256xf32>
    %71 = arith.mulf %5, %70 : vector<1x256xf32>
    %72 = arith.addf %68, %71 : vector<1x256xf32>
    %c15 = arith.constant 15 : index
    %73 = memref.load %arg3[%c15] : memref<16xf32, #tpu.memory_space<smem>>
    %74 = vector.broadcast %73 : f32 to vector<1x256xf32>
    %75 = arith.mulf %7, %74 : vector<1x256xf32>
    %76 = arith.addf %72, %75 : vector<1x256xf32>
    %c3_15 = arith.constant 3 : index
    %77 = memref.load %arg4[%c3_15] : memref<4xf32, #tpu.memory_space<smem>>
    %78 = vector.broadcast %77 : f32 to vector<1x256xf32>
    %79 = arith.addf %76, %78 : vector<1x256xf32>
    %80 = tpu.concatenate %25, %43, %61, %79 in 0 : vector<1x256xf32>, vector<1x256xf32>, vector<1x256xf32>, vector<1x256xf32> -> vector<4x256xf32>
    %cst = arith.constant 0.000000e+00 : f32
    %81 = vector.broadcast %cst : f32 to vector<4x256xf32>
    %82 = arith.maximumf %80, %81 : vector<4x256xf32>
    %c0_16 = arith.constant 0 : index
    %c0_17 = arith.constant 0 : index
    %c0_18 = arith.constant 0 : index
    %83 = vector.load %arg5[%c0_16, %c0_17, %c0_18] : memref<1x4x256xf32, #tpu.memory_space<vmem>>, vector<1x4x256xf32>
    %84 = vector.shape_cast %83 : vector<1x4x256xf32> to vector<4x256xf32>
    %85 = vector.shape_cast %82 : vector<4x256xf32> to vector<1x4x256xf32>
    tpu.vector_store %arg5[%c0_16, %c0_17, %c0_18], %85 {strides = array<i32>} : memref<1x4x256xf32, #tpu.memory_space<vmem>>, vector<1x4x256xf32>,
    return
  }
  func.func @transform_0(%arg0: i32, %arg1: i32) -> (i32, i32, i32) {
    %c0_i32 = arith.constant 0 : i32
    %c0_i32_0 = arith.constant 0 : i32
    return %arg0, %c0_i32, %arg1 : i32, i32, i32
  }
  func.func @transform_1(%arg0: i32, %arg1: i32) -> i32 {
    %c0_i32 = arith.constant 0 : i32
    %c0_i32_0 = arith.constant 0 : i32
    return %c0_i32 : i32
  }
  func.func @transform_2(%arg0: i32, %arg1: i32) -> i32 {
    %c0_i32 = arith.constant 0 : i32
    %c0_i32_0 = arith.constant 0 : i32
    return %c0_i32 : i32
  }
  func.func @transform_3(%arg0: i32, %arg1: i32) -> (i32, i32, i32) {
    %c0_i32 = arith.constant 0 : i32
    %c0_i32_0 = arith.constant 0 : i32
    return %arg0, %c0_i32, %arg1 : i32, i32, i32
  }
}

</mosaic_0001>

<bundles_post_ra>
// kernel: tpu_custom_call.1
= control target key start
LH: loop header
LB: loop body
LE: loop exit
PB: predicated region body
PF: predicated region fallthrough
CT: control target
= control target key end

     0   :  { %8 = vsyncpa [#allocation3], 0  ;;  %s990_s0 = inlined_call_operand.hbm [shape: f32[2,4,256], index: 0, kind: input, shape index: {}]   ;;  %s991_s1 = inlined_call_operand.vmem [shape: f32[16], index: 1, kind: input, shape index: {}]   ;;  %s992_s2 = inlined_call_operand.vmem [shape: f32[4], index: 2, kind: input, shape index: {}]   ;;  %s993_s3 = inlined_call_operand.hbm [shape: f32[2,4,256], index: 3, kind: output, shape index: {}]  }
   0x1   :  { %10 = vsyncpa [#allocation3 + $0x1], 0 }
   0x2   :  { %11 = vsyncpa [#allocation5], 0 }
   0x3   :  { %12 = vsyncpa [#allocation8], 0 }
   0x4   :  { %13 = vsyncpa [#allocation4], 0 }
   0x5   :  { %15 = vsyncpa [#allocation4 + $0x1], 0  ;;  %s793_s12 = smov 0   ;;  %s795_s13 = smov 0  }
   0x6   :  { %s797_s14 = smov 0   ;;  %s799_s15 = smov 0  }
   0x7   :  { %s801_s16 = smov 0   ;;  %s803_s17 = smov 0  }
   0x8 LB: > { %s496_s18 = sadd.s32 4294967295, %s767_s17   ;;  %s497_s19 = sadd.s32 4294967294, %s767_s17   ;;  %s767_s17 = sphi %s803_s17, %s21_s17   ;;  %s763_s16 = sphi %s801_s16, %s1016_s16   ;;  %s759_s15 = sphi %s799_s15, %s1015_s15   ;;  %s755_s14 = sphi %s797_s14, %s1014_s14   ;;  %s751_s13 = sphi %s795_s13, %s1013_s13   ;;  %s747_s12 = sphi %s793_s12, %s1012_s12  }
   0x9   : > { %p55_p0 = scmp.ne.s32.totalorder %s751_s13, %s747_s12  ;;  %p827_p1 = scmp.eq.s32.totalorder %s496_s18, 0 }
   0xa   : > { %p831_p2 = scmp.eq.s32.totalorder %s496_s18, 1  ;;  %p129_p3 = scmp.eq.s32.totalorder %s497_s19, 1 }
   0xb   : > { %s998_s20 = scalar_select %p827_p1, 1, 0 }
   0xc   : > { %s999_s21 = scalar_select %p831_p2, 1, 0 }
   0xd   : > { %p837_p4 = por %p827_p1, %p55_p0  ;;  %p498_p5 = scmp.ge.s32.totalorder %s767_s17, 1 }
   0xe   : > { %p842_p6 = por %p129_p3, %p55_p0  ;;  %p136_p7 = scmp.lt.s32.totalorder %s767_s17, 3 }
   0xf   : > { %s1000_s22 = scalar_select %p837_p4, 1, 0 }
  0x10   : > { %s1001_s23 = scalar_select %p842_p6, 1, 0 }
  0x11   : > { %s149_s26 = sshll.u32 %s991_s1, 4  ;;  %p850_p8 = pnand %p498_p5, %p136_p7  ;;  %s150_s26 = int_to_ptr.vmem [resolvable:$true] %s149_s26 }
  0x12   : > { %s160_s30 = sshll.u32 %s992_s2, 4  ;;  %s621_s5 = scalar_lea.vmem %s150_s26, 16  ;;  %s161_s30 = int_to_ptr.vmem [resolvable:$true] %s160_s30 }
  0x13   : > { %s1002_s27 = scalar_select %p850_p8, 1, 0 }
  0x14   : > { %p550_p10 = pneg %p850_p8  ;;  %p622_p12 = scmp.ne.s32.totalorder %s150_s26, %s621_s5 }
  0x15   : > { %p629_p5 = scmp.lt.s32.totalorder %s150_s26, %s150_s26  ;;  %p630_p7 = scmp.lt.s32.totalorder %s621_s5, %s621_s5 }
  0x16   : > { %p862_p11 = pnand %p550_p10, %p827_p1 }
  0x17   : > { %p631_p9 = por %p630_p7, %p629_p5 }
  0x18   : > { %p623_p13 = pneg %p862_p11 }
  0x1a   : > { %p624_p0 = pnand %p623_p13, %p622_p12 }
  0x1c   : > { %p625_p3 = pneg %p624_p0 }
  0x1e   : > { %p632_p6 = pnand %p631_p9, %p625_p3 }
  0x20   : > { %635 = shalt.err (!%p632_p6)
}
  0x21   : > { %s769_s6 = smov [#allocation6]   ;;  %s636_s7 = scalar_lea.vmem %s161_s30, 16 }
  0x22   : > { %553 = dma.vmem_to_smem (!%p862_p11), %s150_s26, 16, %s769_s6, [#allocation5]  }
  0x23   : > { %p637_p10 = scmp.ne.s32.totalorder %s161_s30, %s636_s7  ;;  %p644_p8 = scmp.lt.s32.totalorder %s161_s30, %s161_s30 }
  0x24   : > { %p645_p2 = scmp.lt.s32.totalorder %s636_s7, %s636_s7 }
  0x25   : > { %p639_p1 = pnand %p637_p10, %p623_p13 }
  0x26   : > { %p646_p12 = por %p645_p2, %p644_p8 }
  0x27   : > { %p640_p4 = pneg %p639_p1 }
  0x29   : > { %p647_p0 = pnand %p646_p12, %p640_p4 }
  0x2b   : > { %650 = shalt.err (!%p647_p0)
}
  0x2c   : > { %s770_s8 = smov [#allocation7]   ;;  %s33_s9 = sadd.s32 1, %s763_s16 }
  0x2d   : > { %556 = dma.vmem_to_smem (!%p862_p11), %s161_s30, 16, %s770_s8, [#allocation8]  }
  0x2e   : > { %s42_s10 = sadd.s32 1, %s755_s14  ;;  %p35_p1 = scmp.ge.s32.totalorder %s33_s9, 2 }
  0x2f   : > { %p49_p2 = scmp.ne.s32.totalorder %s755_s14, %s751_s13  ;;  %p50_p4 = scmp.eq.s32.totalorder %s767_s17, 0 }
  0x30   : > { %p567_p6 = scmp.lt.s32.totalorder %s767_s17, 2  ;;  %s1018_s9 = smov (%p35_p1, %s33_s9), 0 }
  0x31   : > { %p51_p8 = por %p50_p4, %p49_p2  ;;  %p1004_p9 = scmp.ne.s32.totalorder %s999_s21, 0 }
  0x32   : > { %s37_s18 = ssub.s32 %s763_s16, %s1018_s9  ;;  %s171_s19 = sand.u32 1, %s755_s14  }
  0x33   : > { %p882_p13 = por %p1004_p9, %p49_p2  ;;  %p40_p3 = scmp.eq.s32.totalorder %s37_s18, 0 }
  0x34   : > { %s502_s24 = sshll.u32 %s171_s19, 3  ;;  %s536_s25 = sshll.u32 %s763_s16, 7 }
  0x35   : > { %s891_s26 = scalar_select %p40_p3, %s755_s14, %s42_s10  }
  0x36   : > { %s183_s30 = scalar_lea.hbm %s990_s0, %s536_s25  ;;  %s175_s4 = scalar_lea.vmem [#allocation2], %s502_s24 }
  0x37   : > { %s185_s5 = sshll.u32 %s175_s4, 4  ;;  %p898_p11 = pnand %p567_p6, %p51_p8  ;;  %s186_s5 = int_to_ptr.vmem [resolvable:$true] %s185_s5 }
  0x38   : > { %s172_s6 = scalar_lea.sflag [#allocation3], %s171_s19  ;;  %s664_s7 = scalar_lea.vmem %s186_s5, 128 }
  0x39   : > { %p653_p5 = pneg %p898_p11  ;;  %p665_p7 = scmp.ne.s32.totalorder %s186_s5, %s664_s7 }
  0x3a   : > { %s771_s8 = smov [#allocation2]  }
  0x3b   : > { %p667_p10 = pnand %p665_p7, %p653_p5  ;;  %s669_s10 = sshll.u32 %s771_s8, 4  ;;  %s670_s10 = int_to_ptr.vmem [resolvable:$false] %s669_s10 }
  0x3c   : > { %s671_s18 = scalar_lea.vmem %s670_s10, 256  ;;  %p672_p0 = scmp.lt.s32.totalorder %s186_s5, %s670_s10 }
  0x3d   : > { %p668_p12 = pneg %p667_p10  ;;  %p673_p1 = scmp.lt.s32.totalorder %s671_s18, %s664_s7 }
  0x3f   : > { %p674_p2 = por %p673_p1, %p672_p0 }
  0x41   : > { %p675_p4 = pnand %p674_p2, %p668_p12 }
  0x43   : > { %678 = shalt.err (!%p675_p4)
}
  0x44   : > { %560 = dma.hbm_to_vmem [thread:$0]  (!%p898_p11), %s183_s30, 128, %s186_s5, %s172_s6  }
  0x45   : > { %p1007_p6 = scmp.ne.s32.totalorder %s1002_s27, 0 }
  0x46   : > { %s909_s19 = sand.u32 (!%p1007_p6), 1, %s751_s13   ;;  %p1008_p8 = scmp.ne.s32.totalorder (!%p1007_p6), %s1000_s22, 0 }
  0x47   : > { %194 = sbr.rel (%p1007_p6) target bundleno = 137 (0x89), region = 32  ;;  %s506_s24 = sshll.u32 (!%p1007_p6), %s909_s19, 3 }
  0x48   : > { %s197_s25 = scalar_lea.sflag (!%p1007_p6), [#allocation3], %s909_s19  ;;  %s200_s28 = scalar_lea.vmem (!%p1007_p6), [#allocation2], %s506_s24 }
  0x4c   : > { %730 = dma.done.wait (%p1008_p8), %s197_s25, 128  }
  0x4d   : > { %732 = vsyncadd (%p1008_p8), %s197_s25, 4294967168  ;;  %p1009_p9 = scmp.ne.s32.totalorder %s998_s20, 0 }
  0x4f   : > { %734 = dma.done.wait (%p1009_p9), [#allocation5], 16  }
  0x50   : > { %736 = vsyncadd (%p1009_p9), [#allocation5], 4294967280 }
  0x51   : > { %738 = dma.done.wait (%p1009_p9), [#allocation8], 16  }
  0x52   : > { %740 = vsyncadd (%p1009_p9), [#allocation8], 4294967280 }
  0x53   : > { %213 = sfence }
  0x54   : > { %s241_s27 = sld [smem:[#allocation6]]  ;;  %v234_v0 = vld [vmem:[%s200_s28] ss:$4 sm:$0x3]  ;;  %v314_v12 = vlaneseq  ;;  %vm357_vm0 = vcmask 1040384   ;;  %vm360_vm1 = vcmask 1041408  }
  0x55   : > { %s513_s29 = sld [smem:[#allocation6 + $0x1]]  ;;  %v510_v1 = vld [vmem:[%s200_s28 + $0x1] ss:$4 sm:$0x3]  ;;  %vm363_vm2 = vcmask 1042432  }
  0x56   : > { %s514_s30 = sld [smem:[#allocation6 + $0x2]]  ;;  %v929_v3 = vld [vmem:[%s200_s28 + $0x2] ss:$4 sm:$0x3]  ;;  %v315_v22 = vshrl.u32 %v314_v12, 7 }
  0x57   : > { %s515_s4 = sld [smem:[#allocation6 + $0x3]]  ;;  %v512_v6 = vld [vmem:[%s200_s28 + $0x3] ss:$4 sm:$0x3] }
  0x58   : > { %s927_s22 = sld [smem:[#allocation7]]  ;;  %v316_v34 = vsub.s32 0, %v315_v22  ;;  %v320_v41 = vsub.s32 1, %v315_v22 }
  0x59   : > { %s516_s5 = sld [smem:[#allocation6 + $0x4]] }
  0x5a   : > { %v242_v2 = vstv %s241_s27  ;;  %s517_s21 = sld [smem:[#allocation6 + $0x5]] }
  0x5b   : > { %v243_v4 = vmul.f32 %v242_v2, %v234_v0  ;;  %v245_v5 = vstv %s513_s29  ;;  %s518_s6 = sld [smem:[#allocation6 + $0x6]] }
  0x5c   : > { %v246_v7 = vmul.f32 %v510_v1, %v245_v5  ;;  %v249_v8 = vstv %s514_s30  ;;  %s519_s20 = sld [smem:[#allocation6 + $0x7]] }
  0x5d   : > { %v250_v9 = vmul.f32 %v929_v3, %v249_v8  ;;  %v253_v10 = vstv %s515_s4  ;;  %s932_s7 = sld [smem:[#allocation7 + $0x1]] }
  0x5e   : > { %v247_v11 = vadd.f32 %v246_v7, %v243_v4  ;;  %s521_s8 = sld [smem:[#allocation6 + $0x8]]  ;;  %v254_v13 = vmul.f32 %v512_v6, %v253_v10  ;;  %v257_v26 = vstv %s927_s22 }
  0x5f   : > { %v260_v14 = vstv %s516_s5  ;;  %s522_s10 = sld [smem:[#allocation6 + $0x9]]  ;;  %s231_s5 = scalar_lea.vmem [#allocation9], %s506_s24 }
  0x60   : > { %v251_v15 = vadd.f32 %v250_v9, %v247_v11  ;;  %v261_v16 = vmul.f32 %v260_v14, %v234_v0  ;;  %v263_v17 = vstv %s517_s21  ;;  %s523_s18 = sld [smem:[#allocation6 + $0xa]]  ;;  %s390_s21 = sshll.u32 %s231_s5, 4  ;;  %s945_s21 = int_to_ptr.vmem [resolvable:$true] %s390_s21 }
  0x61   : > { %v264_v18 = vmul.f32 %v510_v1, %v263_v17  ;;  %v267_v19 = vstv %s518_s6  ;;  %s524_s25 = sld [smem:[#allocation6 + $0xb]]  ;;  %s537_s6 = sshll.u32 %s759_s15, 7 }
  0x62   : > { %v268_v20 = vmul.f32 %v929_v3, %v267_v19  ;;  %v271_v21 = vstv %s519_s20  ;;  %s935_s28 = sld [smem:[#allocation7 + $0x2]]  ;;  %v255_v23 = vadd.f32 %v254_v13, %v251_v15  ;;  %s772_s15 = smov [#allocation9]  }
  0x63   : > { %v265_v24 = vadd.f32 %v264_v18, %v261_v16  ;;  %v272_v25 = vmul.f32 %v512_v6, %v271_v21  ;;  %s526_s27 = sld [smem:[#allocation6 + $0xc]]  ;;  %v275_v31 = vstv %s932_s7  ;;  %s683_s24 = sshll.u32 %s772_s15, 4  ;;  %s684_s24 = int_to_ptr.vmem [resolvable:$false] %s683_s24 }
  0x64   : > { %v278_v27 = vstv %s521_s8  ;;  %s527_s29 = sld [smem:[#allocation6 + $0xd]]  ;;  %v258_v35 = vadd.f32 %v257_v26, %v255_v23  ;;  %s388_s8 = scalar_lea.hbm %s993_s3, %s537_s6 }
  0x65   : > { %v269_v28 = vadd.f32 %v268_v20, %v265_v24  ;;  %v279_v29 = vmul.f32 %v278_v27, %v234_v0  ;;  %v281_v30 = vstv %s522_s10  ;;  %s528_s30 = sld [smem:[#allocation6 + $0xe]]  ;;  %s374_s10 = scalar_lea.sflag [#allocation4], %s909_s19 }
  0x66   : > { %v282_v32 = vmul.f32 %v510_v1, %v281_v30  ;;  %v285_v33 = vstv %s523_s18  ;;  %s529_s4 = sld [smem:[#allocation6 + $0xf]]  ;;  %v317_v50 = vrot.slane %v258_v35, %v316_v34  ;;  %v321_v54 = vrot.slane %v258_v35, %v320_v41  ;;  %s679_s18 = scalar_lea.vmem %s945_s21, 128 }
  0x67   : > { %v273_v36 = vadd.f32 %v272_v25, %v269_v28  ;;  %v286_v37 = vmul.f32 %v929_v3, %v285_v33  ;;  %v289_v38 = vstv %s524_s25  ;;  %s530_s22 = sld [smem:[#allocation7 + $0x3]]  ;;  %p680_p3 = scmp.ne.s32.totalorder %s945_s21, %s679_s18 }
  0x68   : > { %v283_v39 = vadd.f32 %v282_v32, %v279_v29  ;;  %v290_v40 = vmul.f32 %v512_v6, %v289_v38  ;;  %v293_v47 = vstv %s935_s28  ;;  %s685_s25 = scalar_lea.vmem %s684_s24, 256  ;;  %p686_p7 = scmp.lt.s32.totalorder %s945_s21, %s684_s24 }
  0x69   : > { %v276_v42 = vadd.f32 %v275_v31, %v273_v36  ;;  %v296_v43 = vstv %s526_s27  ;;  %p681_p11 = pnand %p680_p3, %p882_p13  ;;  %p687_p10 = scmp.lt.s32.totalorder %s685_s25, %s679_s18 }
  0x6a   : > { %v287_v44 = vadd.f32 %v286_v37, %v283_v39  ;;  %v297_v45 = vmul.f32 %v296_v43, %v234_v0  ;;  %v299_v46 = vstv %s527_s29 }
  0x6b   : > { %v300_v48 = vmul.f32 %v510_v1, %v299_v46  ;;  %v303_v49 = vstv %s528_s30  ;;  %v328_v57 = vrot.slane %v276_v42, %v316_v34  ;;  %v332_v58 = vrot.slane %v276_v42, %v320_v41  ;;  %p682_p5 = pneg %p681_p11  ;;  %p688_p12 = por %p687_p10, %p686_p7 }
  0x6c   : > { %v291_v51 = vadd.f32 %v290_v40, %v287_v44  ;;  %v304_v52 = vmul.f32 %v929_v3, %v303_v49  ;;  %v307_v53 = vstv %s529_s4 }
  0x6d   : > { %v301_v55 = vadd.f32 %v300_v48, %v297_v45  ;;  %v308_v56 = vmul.f32 %v512_v6, %v307_v53  ;;  %v311_v61 = vstv %s530_s22  ;;  %v358_v1 = vsel %vm357_vm0, %v317_v50, %v328_v57  ;;  %p689_p0 = pnand %p688_p12, %p682_p5 }
  0x6e   : > { %v294_v59 = vadd.f32 %v293_v47, %v291_v51  ;;  %v359_v2 = vsel %vm357_vm0, %v321_v54, %v332_v58 }
  0x6f   : > { %v305_v60 = vadd.f32 %v304_v52, %v301_v55 }
  0x70   : > { %v339_v62 = vrot.slane %v294_v59, %v316_v34  ;;  %v343_v63 = vrot.slane %v294_v59, %v320_v41 }
  0x71   : > { %v309_v0 = vadd.f32 %v308_v56, %v305_v60 }
  0x72   : > { %v361_v3 = vsel %vm360_vm1, %v358_v1, %v339_v62  ;;  %v362_v5 = vsel %vm360_vm1, %v359_v2, %v343_v63 }
  0x73   : > { %v312_v4 = vadd.f32 %v311_v61, %v309_v0 }
  0x75   : > { %v350_v6 = vrot.slane %v312_v4, %v316_v34  ;;  %v354_v7 = vrot.slane %v312_v4, %v320_v41 }
  0x77   : > { %v364_v8 = vsel %vm363_vm2, %v361_v3, %v350_v6  ;;  %v365_v9 = vsel %vm363_vm2, %v362_v5, %v354_v7 }
  0x78   : > { %v366_v10 = vmax.f32 %v364_v8, 0.0  ;;  %v367_v11 = vmax.f32 %v365_v9, 0.0 }
  0x7a   : > { %v370_v12 = vcombine.low %v366_v10, %v367_v11 }
  0x7c   : > { %372 = vst [vmem:[%s231_s5] sm:$0xff] %v370_v12 }
  0x7d   : > { %692 = shalt.err (!%p689_p0)
}
  0x7e   : > { %s693_s28 = scalar_lea.hbm %s388_s8, 128  ;;  %s697_s29 = scalar_lea.hbm %s993_s3, 256 }
  0x7f   : > { %p694_p1 = scmp.ne.s32.totalorder %s388_s8, %s693_s28  ;;  %p698_p6 = scmp.lt.s32.totalorder %s388_s8, %s993_s3 }
  0x80   : > { %p699_p8 = scmp.lt.s32.totalorder %s697_s29, %s693_s28 }
  0x81   : > { %p695_p2 = pnand %p694_p1, %p882_p13 }
  0x82   : > { %p700_p9 = por %p699_p8, %p698_p6 }
  0x83   : > { %p696_p4 = pneg %p695_p2 }
  0x85   : > { %p701_p3 = pnand %p700_p9, %p696_p4 }
  0x87   : > { %704 = shalt.err (!%p701_p3)
}
  0x88   : > { %548 = dma.vmem_to_hbm [thread:$0]  (%p882_p13), %s945_s21, 128, %s388_s8, %s374_s10  }
  0x89 PF: > { %s402_s22 = sand.u32 1, %s747_s12   ;;  %p1010_p11 = scmp.ne.s32.totalorder %s1001_s23, 0 }
  0x8a   : > { %p1011_p5 = scmp.ge.s32.totalorder %s767_s17, 2  ;;  %s403_s5 = scalar_lea.sflag [#allocation4], %s402_s22 }
  0x8c   : > { %p562_p7 = pnand %p1011_p5, %p1010_p11 }
  0x8e   : > { %p563_p10 = pneg %p562_p7 }
  0x90   : > { %742 = dma.done.wait (%p563_p10), %s403_s5, 128  }
  0x91   : > { %744 = vsyncadd (%p563_p10), %s403_s5, 4294967168  ;;  %s21_s17 = sadd.s32 1, %s767_s17   ;;  %s1012_s12 = smov %s751_s13 }
  0x92   : > { %p18_p12 = scmp.ge.s32.totalorder %s21_s17, 4   ;;  %s1013_s13 = smov %s755_s14 }
  0x93   : > { %s1014_s14 = smov %s891_s26  ;;  %s1015_s15 = smov %s763_s16 }
  0x94   : > { %s1016_s16 = smov %s1018_s9  ;;  %20 = sbr.rel (!%p18_p12) target bundleno = 8 (0x8), region = 89 }
  0x99   :  { %408 = vsyncpa [#allocation3], 1 }
  0x9a   :  { %410 = vsyncpa [#allocation3 + $0x1], 1 }
  0x9b   :  { %411 = vsyncpa [#allocation4], 1 }
  0x9c   :  { %413 = vsyncpa [#allocation4 + $0x1], 1 }
  0x9d   :  { %414 = vsyncpa [#allocation5], 1 }
  0x9e   :  { %416 = vsyncpa [#allocation5 + $0x1], 1 }
  0x9f   :  { %417 = vsyncpa [#allocation8], 1 }

</bundles_post_ra>
